<compile_context>
chip_gen: v5e
topology: v5e:2x2
jax: 0.10.0
libtpu: 0.0.40
codegen_flags: <defaults>
</compile_context>

<pallas_src>
import jax
import jax.numpy as jnp
from jax.experimental import pallas as pl
from jax.experimental.pallas import tpu as pltpu


def _round_up(n, m):
    return ((n + m - 1) // m) * m


def actor_mlp_kernel(xt_ref, w1_ref, b1_ref, w2t_ref, b2_ref, out_ref):
    # xt_ref:  (3, TB)    observations, feature-major (batch on lanes)
    # w1_ref:  (128, 3)   torch layer-1 weight, as-is (out-features on sublanes)
    # b1_ref:  (128, 1)   layer-1 bias
    # w2t_ref: (128, 2)   torch layer-2 weight transposed (in-features on sublanes)
    # b2_ref:  (2,)       layer-2 bias, SMEM scalars
    # out_ref: (2, TB)    row 0 = mean, row 1 = log_std (lane-dense)
    xt = xt_ref[...]
    w1 = w1_ref[...]

    # Layer 1 on the VPU: K = 3 -> three rank-1 multiply-adds, h is (128, TB).
    h = (w1[:, 0:1] * xt[0:1, :]
         + w1[:, 1:2] * xt[1:2, :]
         + w1[:, 2:3] * xt[2:3, :]
         + b1_ref[...])
    h = jnp.maximum(h, 0.0)  # ReLU

    # Layer 2: N = 2 -> two weighted sublane reductions over the feature axis.
    w2t = w2t_ref[...]
    mean_row = jnp.sum(h * w2t[:, 0:1], axis=0, keepdims=True) + b2_ref[0]
    logstd_row = jnp.sum(h * w2t[:, 1:2], axis=0, keepdims=True) + b2_ref[1]

    # Single lane-dense store of the whole head.
    out_ref[...] = jnp.concatenate([mean_row, logstd_row], axis=0)


def actor_forward(x, params):
    """net(x) + NormalPredictor.to_param split, fused in one Pallas kernel.

    x: (B, 3) float32 observations.  Returns (mean, log_std), each (B, 1).
    """
    w1, b1, w2t, b2 = params
    B = x.shape[0]

    # Lane-dense batch tiling: TB is a multiple of 128, capped at 2048, and for
    # batches >= 256 we force at least 2 grid steps (v7x megacore sharding).
    Bp0 = _round_up(max(B, 1), 128)
    TB = min(2048, Bp0)
    if Bp0 >= 256:
        TB = min(TB, _round_up(-(-Bp0 // 2), 128))
    Bp = _round_up(Bp0, TB)

    # Feature-major input: (3, Bp), batch on the lane axis.  The transpose /
    # pad here is cheap layout plumbing on a tiny (B, 3) tensor.
    xt = x.T
    if Bp != B:
        xt = jnp.pad(xt, ((0, 0), (0, Bp - B)))

    out = pl.pallas_call(
        actor_mlp_kernel,
        out_shape=jax.ShapeDtypeStruct((2, Bp), jnp.float32),
        grid=(Bp // TB,),
        in_specs=[
            pl.BlockSpec((3, TB), lambda i: (0, i)),      # x.T: tiled over batch
            pl.BlockSpec((128, 3), lambda i: (0, 0)),     # W1: resident
            pl.BlockSpec((128, 1), lambda i: (0, 0)),     # b1: resident
            pl.BlockSpec((128, 2), lambda i: (0, 0)),     # W2.T: resident
            pl.BlockSpec(memory_space=pltpu.MemorySpace.SMEM),  # b2 scalars
        ],
        out_specs=pl.BlockSpec((2, TB), lambda i: (0, i)),
        compiler_params=pltpu.CompilerParams(
            dimension_semantics=("parallel",)),
    )(xt, w1, b1, w2t, b2)

    # Free split + drop of padded batch columns.
    mean = out[0, :B][:, None]
    log_std = out[1, :B][:, None]
    return mean, log_std


def init_params(key):
    """Deterministic init mimicking torch.nn.Linear (uniform +/- 1/sqrt(fan_in)).

    Layouts are chosen for the feature-major kernel:
      w1  (128, 3)  == torch Linear(3, 128).weight (no transpose needed)
      b1  (128, 1)
      w2t (128, 2)  == torch Linear(128, 2).weight.T
      b2  (2,)
    """
    k1, k2, k3, k4 = jax.random.split(key, 4)
    lim1 = 1.0 / jnp.sqrt(3.0)
    lim2 = 1.0 / jnp.sqrt(128.0)
    w1 = jax.random.uniform(k1, (128, 3), jnp.float32, -lim1, lim1)
    b1 = jax.random.uniform(k2, (128, 1), jnp.float32, -lim1, lim1)
    w2t = jax.random.uniform(k3, (128, 2), jnp.float32, -lim2, lim2)
    b2 = jax.random.uniform(k4, (2,), jnp.float32, -lim2, lim2)
    return w1, b1, w2t, b2


def _reference(x, params):
    # Plain-JAX reference of the same forward pass.
    # TODO(synk): NormalPredictor.to_param is not defined in the provided
    # source; we assume the standard "chunk into mean / log_std" behaviour
    # (any log_std clamping / tanh squashing lives in TanhGaussian, not here).
    w1, b1, w2t, b2 = params
    h = jnp.maximum(x @ w1.T + b1.T, 0.0)
    y = h @ w2t + b2[None, :]
    return jnp.split(y, 2, axis=-1)


if __name__ == "__main__":
    key = jax.random.PRNGKey(0)
    pkey, xkey1, xkey2 = jax.random.split(key, 3)
    params = init_params(pkey)

    # Small batch (single grid step, padded 8 -> 128 lanes).
    B1 = 8
    x1 = jax.random.normal(xkey1, (B1, 3), jnp.float32)
    mean1, log_std1 = actor_forward(x1, params)
    jax.block_until_ready((mean1, log_std1))

    # Mid-size batch (exercises padding + 2 grid steps / megacore path).
    B2 = 300
    x2 = jax.random.normal(xkey2, (B2, 3), jnp.float32)
    mean2, log_std2 = actor_forward(x2, params)
    jax.block_until_ready((mean2, log_std2))

    for (m, s, x, B) in ((mean1, log_std1, x1, B1), (mean2, log_std2, x2, B2)):
        m_exp, s_exp = _reference(x, params)
        assert m.shape == (B, 1) and s.shape == (B, 1)
        assert jnp.allclose(m, m_exp, atol=1e-5, rtol=1e-5)
        assert jnp.allclose(s, s_exp, atol=1e-5, rtol=1e-5)

    print("KERNEL_OK")
</pallas_src>

<mosaic_0001>
module attributes {stable_mosaic.version = 11 : i64} {
  func.func @actor_mlp_kernel(%arg0: i32, %arg1: memref<3x128xf32, #tpu.memory_space<vmem>>, %arg2: memref<128x3xf32, #tpu.memory_space<vmem>>, %arg3: memref<128x1xf32, #tpu.memory_space<vmem>>, %arg4: memref<128x2xf32, #tpu.memory_space<vmem>>, %arg5: memref<2xf32, #tpu.memory_space<smem>>, %arg6: memref<2x128xf32, #tpu.memory_space<vmem>>) attributes {dimension_semantics = [#tpu.dimension_semantics<parallel>], iteration_bounds = array<i64: 1>, scalar_prefetch = 0 : i64, scratch_operands = 0 : i64, tpu.core_type = #tpu.core_type<tc>, window_params = [{transform_indices = @transform_0, window_bounds = array<i64: 3, 128>}, {pipeline_mode = #tpu.pipeline_mode<synchronous>, transform_indices = @transform_1, window_bounds = array<i64: 128, 3>}, {pipeline_mode = #tpu.pipeline_mode<synchronous>, transform_indices = @transform_2, window_bounds = array<i64: 128, 1>}, {pipeline_mode = #tpu.pipeline_mode<synchronous>, transform_indices = @transform_3, window_bounds = array<i64: 128, 2>}, {transform_indices = @transform_4, window_bounds = array<i64: 2>}, {transform_indices = @transform_5, window_bounds = array<i64: 2, 128>}]} {
    %c0 = arith.constant 0 : index
    %c0_0 = arith.constant 0 : index
    %0 = vector.load %arg1[%c0, %c0_0] : memref<3x128xf32, #tpu.memory_space<vmem>>, vector<3x128xf32>
    %c0_1 = arith.constant 0 : index
    %c0_2 = arith.constant 0 : index
    %1 = vector.load %arg2[%c0_1, %c0_2] : memref<128x3xf32, #tpu.memory_space<vmem>>, vector<128x3xf32>
    %2 = vector.extract_strided_slice %1 {offsets = [0, 0], sizes = [128, 1], strides = [1, 1]} : vector<128x3xf32> to vector<128x1xf32>
    %3 = vector.extract_strided_slice %0 {offsets = [0, 0], sizes = [1, 128], strides = [1, 1]} : vector<3x128xf32> to vector<1x128xf32>
    %4 = vector.broadcast %2 : vector<128x1xf32> to vector<128x128xf32>
    %5 = vector.broadcast %3 : vector<1x128xf32> to vector<128x128xf32>
    %6 = arith.mulf %4, %5 : vector<128x128xf32>
    %7 = vector.extract_strided_slice %1 {offsets = [0, 1], sizes = [128, 1], strides = [1, 1]} : vector<128x3xf32> to vector<128x1xf32>
    %8 = vector.extract_strided_slice %0 {offsets = [1, 0], sizes = [1, 128], strides = [1, 1]} : vector<3x128xf32> to vector<1x128xf32>
    %9 = vector.broadcast %7 : vector<128x1xf32> to vector<128x128xf32>
    %10 = vector.broadcast %8 : vector<1x128xf32> to vector<128x128xf32>
    %11 = arith.mulf %9, %10 : vector<128x128xf32>
    %12 = arith.addf %6, %11 : vector<128x128xf32>
    %13 = vector.extract_strided_slice %1 {offsets = [0, 2], sizes = [128, 1], strides = [1, 1]} : vector<128x3xf32> to vector<128x1xf32>
    %14 = vector.extract_strided_slice %0 {offsets = [2, 0], sizes = [1, 128], strides = [1, 1]} : vector<3x128xf32> to vector<1x128xf32>
    %15 = vector.broadcast %13 : vector<128x1xf32> to vector<128x128xf32>
    %16 = vector.broadcast %14 : vector<1x128xf32> to vector<128x128xf32>
    %17 = arith.mulf %15, %16 : vector<128x128xf32>
    %18 = arith.addf %12, %17 : vector<128x128xf32>
    %c0_3 = arith.constant 0 : index
    %c0_4 = arith.constant 0 : index
    %19 = vector.load %arg3[%c0_3, %c0_4] : memref<128x1xf32, #tpu.memory_space<vmem>>, vector<128x1xf32>
    %20 = vector.broadcast %19 : vector<128x1xf32> to vector<128x128xf32>
    %21 = arith.addf %18, %20 : vector<128x128xf32>
    %cst = arith.constant 0.000000e+00 : f32
    %22 = vector.broadcast %cst : f32 to vector<128x128xf32>
    %23 = arith.maximumf %21, %22 : vector<128x128xf32>
    %c0_5 = arith.constant 0 : index
    %c0_6 = arith.constant 0 : index
    %24 = vector.load %arg4[%c0_5, %c0_6] : memref<128x2xf32, #tpu.memory_space<vmem>>, vector<128x2xf32>
    %25 = vector.extract_strided_slice %24 {offsets = [0, 0], sizes = [128, 1], strides = [1, 1]} : vector<128x2xf32> to vector<128x1xf32>
    %26 = vector.broadcast %25 : vector<128x1xf32> to vector<128x128xf32>
    %27 = arith.mulf %23, %26 : vector<128x128xf32>
    %cst_7 = arith.constant dense<0.000000e+00> : vector<128xf32>
    %28 = vector.multi_reduction <add>, %27, %cst_7 [0] : vector<128x128xf32> to vector<128xf32>
    %29 = vector.shape_cast %28 : vector<128xf32> to vector<1x128xf32>
    %c0_8 = arith.constant 0 : index
    %30 = memref.load %arg5[%c0_8] : memref<2xf32, #tpu.memory_space<smem>>
    %31 = vector.broadcast %30 : f32 to vector<1x128xf32>
    %32 = arith.addf %29, %31 : vector<1x128xf32>
    %33 = vector.extract_strided_slice %24 {offsets = [0, 1], sizes = [128, 1], strides = [1, 1]} : vector<128x2xf32> to vector<128x1xf32>
    %34 = vector.broadcast %33 : vector<128x1xf32> to vector<128x128xf32>
    %35 = arith.mulf %23, %34 : vector<128x128xf32>
    %cst_9 = arith.constant dense<0.000000e+00> : vector<128xf32>
    %36 = vector.multi_reduction <add>, %35, %cst_9 [0] : vector<128x128xf32> to vector<128xf32>
    %37 = vector.shape_cast %36 : vector<128xf32> to vector<1x128xf32>
    %c1 = arith.constant 1 : index
    %38 = memref.load %arg5[%c1] : memref<2xf32, #tpu.memory_space<smem>>
    %39 = vector.broadcast %38 : f32 to vector<1x128xf32>
    %40 = arith.addf %37, %39 : vector<1x128xf32>
    %41 = tpu.concatenate %32, %40 in 0 : vector<1x128xf32>, vector<1x128xf32> -> vector<2x128xf32>
    %c0_10 = arith.constant 0 : index
    %c0_11 = arith.constant 0 : index
    %42 = vector.load %arg6[%c0_10, %c0_11] : memref<2x128xf32, #tpu.memory_space<vmem>>, vector<2x128xf32>
    tpu.vector_store %arg6[%c0_10, %c0_11], %41 {strides = array<i32>} : memref<2x128xf32, #tpu.memory_space<vmem>>, vector<2x128xf32>,
    return
  }
  func.func @transform_0(%arg0: i32) -> (i32, i32) {
    %c0_i32 = arith.constant 0 : i32
    %c0_i32_0 = arith.constant 0 : i32
    return %c0_i32, %arg0 : i32, i32
  }
  func.func @transform_1(%arg0: i32) -> (i32, i32) {
    %c0_i32 = arith.constant 0 : i32
    %c0_i32_0 = arith.constant 0 : i32
    %c0_i32_1 = arith.constant 0 : i32
    return %c0_i32, %c0_i32_0 : i32, i32
  }
  func.func @transform_2(%arg0: i32) -> (i32, i32) {
    %c0_i32 = arith.constant 0 : i32
    %c0_i32_0 = arith.constant 0 : i32
    %c0_i32_1 = arith.constant 0 : i32
    return %c0_i32, %c0_i32_0 : i32, i32
  }
  func.func @transform_3(%arg0: i32) -> (i32, i32) {
    %c0_i32 = arith.constant 0 : i32
    %c0_i32_0 = arith.constant 0 : i32
    %c0_i32_1 = arith.constant 0 : i32
    return %c0_i32, %c0_i32_0 : i32, i32
  }
  func.func @transform_4(%arg0: i32) -> i32 {
    %c0_i32 = arith.constant 0 : i32
    %c0_i32_0 = arith.constant 0 : i32
    return %c0_i32 : i32
  }
  func.func @transform_5(%arg0: i32) -> (i32, i32) {
    %c0_i32 = arith.constant 0 : i32
    %c0_i32_0 = arith.constant 0 : i32
    return %c0_i32, %arg0 : i32, i32
  }
}

</mosaic_0001>

<bundles_post_ra>
// kernel: tpu_custom_call.1
= control target key start
LH: loop header
LB: loop body
LE: loop exit
PB: predicated region body
PF: predicated region fallthrough
CT: control target
= control target key end

     0   :  { %10 = vsyncpa [#allocation4], 0  ;;  %s1280_s0 = inlined_call_operand.vmem [shape: f32[3,128], index: 0, kind: input, shape index: {}]   ;;  %s1281_s1 = inlined_call_operand.vmem [shape: f32[128,3], index: 1, kind: input, shape index: {}]   ;;  %s1282_s2 = inlined_call_operand.vmem [shape: f32[128,1], index: 2, kind: input, shape index: {}]   ;;  %s1283_s3 = inlined_call_operand.vmem [shape: f32[128,2], index: 3, kind: input, shape index: {}]   ;;  %s1284_s4 = inlined_call_operand.vmem [shape: f32[2], index: 4, kind: input, shape index: {}]   ;;  %s1285_s5 = inlined_call_operand.hbm [shape: f32[2,128], index: 5, kind: output, shape index: {}]  }
   0x1   :  { %11 = vsyncpa [#allocation3], 0  ;;  %s25_s20 = sshll.u32 %s1284_s4, 4  ;;  %s789_s21 = smov [#allocation2]   ;;  %s26_s20 = int_to_ptr.vmem [resolvable:$true] %s25_s20 }
   0x2   :  { %28 = dma.vmem_to_smem %s26_s20, 16, %s789_s21, [#allocation4]  }
   0x3   :  { %785 = dma.done.wait [#allocation4], 16  }
   0x4   :  { %786 = vsyncadd [#allocation4], 4294967280 }
   0x5   :  { %33 = sfence }
   0x6   :  { %v830_v0 = vld [vmem:[%s1281_s1 + $0x20] sm:$0xff]  ;;  %v835_v1 = vld [vmem:[%s1281_s1 + $0x10] sm:$0xff]  ;;  %v790_v3 = vmov 2   ;;  %v791_v4 = vmov 0   ;;  %v40_v5 = vld [vmem:[%s1281_s1 + $0x28] sm:$0xff]  ;;  %v792_v14 = vmov 1  }
   0x7   :  { %v35_v2 = vld [vmem:[%s1281_s1] sm:$0xff]  ;;  %740 = vset.pattern.permute.xlu0 %v790_v3  ;;  %737 = vset.pattern.permute.xlu2 %v791_v4  ;;  %v38_v6 = vld [vmem:[%s1281_s1 + $0x18] sm:$0xff]  ;;  %v865_v10 = vld [vmem:[%s1281_s1 + $0x50] sm:$0xff]  ;;  %s730_s10 = sld [smem:[#allocation2 + $0x1]]  ;;  %s793_s11 = smov [#allocation5]   ;;  %vm710_vm0 = vcmask 1040384  }
   0x8   :  { %736 = vset.pattern.permute.xlu1 %v791_v4  ;;  %73 = vperm.xlu2 %737, %v830_v0   ;;  %v43_v7 = vld [vmem:[%s1281_s1 + $0x40] sm:$0xff]  ;;  %v856_v8 = vld [vmem:[%s1281_s1 + $0x38] sm:$0xff]  ;;  %v49_v11 = vld [vmem:[%s1281_s1 + $0x70] sm:$0xff]  ;;  %s718_s12 = sshll.u32 %s793_s11, 4  ;;  %s720_s15 = sshll.u32 %s1285_s5, 4  ;;  %s719_s12 = int_to_ptr.vmem [resolvable:$true] %s718_s12  ;;  %s721_s15 = int_to_ptr.hbm [resolvable:$true] %s720_s15 }
   0x9   :  { %63 = vperm.xlu1 %736, %v835_v1   ;;  %246 = vperm.xlu0 %740, %v35_v2   ;;  %v46_v9 = vld [vmem:[%s1281_s1 + $0x58] sm:$0xff]  ;;  %v874_v12 = vld [vmem:[%s1281_s1 + $0x68] sm:$0xff]  ;;  %v41_v15 = vld [vmem:[%s1281_s1 + $0x30] sm:$0xff] }
   0xa   :  { %v36_v13 = vld [vmem:[%s1281_s1 + $0x8] sm:$0xff]  ;;  %v47_v17 = vld [vmem:[%s1281_s1 + $0x60] sm:$0xff]  ;;  %v50_v18 = vld [vmem:[%s1281_s1 + $0x78] sm:$0xff] }
   0xb   :  { %v44_v16 = vld [vmem:[%s1281_s1 + $0x48] sm:$0xff]  ;;  %v348_v21 = vld [vmem:[%s1282_s2 + $0x30] sm:$0xff]  ;;  %v354_v25 = vld [vmem:[%s1282_s2 + $0x60] sm:$0xff] }
   0xc   :  { %v343_v19 = vld [vmem:[%s1282_s2 + $0x8] sm:$0xff]  ;;  %v357_v29 = vld [vmem:[%s1282_s2 + $0x78] sm:$0xff]  ;;  %v933_v33 = vld [vmem:[%s1283_s3 + $0x10] sm:$0xff] }
   0xd   :  { %v351_v23 = vld [vmem:[%s1282_s2 + $0x48] sm:$0xff]  ;;  %v342_v34 = vld [vmem:[%s1282_s2] sm:$0xff]  ;;  %v345_v41 = vld [vmem:[%s1282_s2 + $0x18] sm:$0xff] }
   0xe   :  { %v947_v38 = vld [vmem:[%s1283_s3 + $0x28] sm:$0xff]  ;;  %v34_v39 = vld [vmem:[%s1280_s0] sm:$0x7]  ;;  %v344_v42 = vld [vmem:[%s1282_s2 + $0x10] sm:$0xff] }
   0xf   :  { %v952_v40 = vperm.slane %v34_v39, 1  ;;  %v961_v43 = vperm.slane %v34_v39, 0  ;;  %v975_v50 = vld [vmem:[%s1283_s3 + $0x40] sm:$0xff]  ;;  %v347_v51 = vld [vmem:[%s1282_s2 + $0x28] sm:$0xff]  ;;  %v991_v56 = vld [vmem:[%s1283_s3 + $0x58] sm:$0xff]  ;;  %v1000_v59 = vperm.slane %v34_v39, 2 }
  0x10   :  { %78 = vperm.xlu2 %737, %v40_v5   ;;  %v346_v52 = vld [vmem:[%s1282_s2 + $0x20] sm:$0xff]  ;;  %v349_v58 = vld [vmem:[%s1282_s2 + $0x38] sm:$0xff] }
  0x11   :  { %68 = vperm.xlu1 %736, %v38_v6   ;;  %266 = vperm.xlu0 %740, %v40_v5   ;;  %v350_v57 = vld [vmem:[%s1282_s2 + $0x40] sm:$0xff] }
  0x18   :  { %93 = vperm.xlu2 %737, %v43_v7  }
  0x19   :  { %88 = vperm.xlu1 %736, %v856_v8   ;;  %278 = vperm.xlu0 %740, %v43_v7  }
  0x20   :  { %108 = vperm.xlu2 %737, %v46_v9  }
  0x21   :  { %103 = vperm.xlu1 %736, %v865_v10   ;;  %290 = vperm.xlu0 %740, %v46_v9  }
  0x28   :  { %123 = vperm.xlu2 %737, %v49_v11  }
  0x29   :  { %118 = vperm.xlu1 %736, %v874_v12   ;;  %302 = vperm.xlu0 %740, %v49_v11  }
  0x30   :  { %739 = vset.pattern.permute.xlu2 %v792_v14 }
  0x31   :  { %738 = vset.pattern.permute.xlu1 %v792_v14  ;;  %743 = vset.pattern.permute.xlu0 %v791_v4 }
  0x32   :  { %153 = vperm.xlu2 %739, %v36_v13   ;;  %53 = vperm.xlu0 %743, %v35_v2  }
  0x33   :  { %149 = vperm.xlu1 %738, %v35_v2   ;;  %v1007_v2 = vld [vmem:[%s1283_s3 + $0x70] sm:$0xff] }
  0x3a   :  { %165 = vperm.xlu2 %739, %v830_v0   ;;  %58 = vperm.xlu0 %743, %v36_v13  }
  0x3b   :  { %161 = vperm.xlu1 %738, %v38_v6  }
  0x42   :  { %173 = vperm.xlu2 %739, %v41_v15   ;;  %83 = vperm.xlu0 %743, %v41_v15  }
  0x43   :  { %169 = vperm.xlu1 %738, %v40_v5   ;;  %v353_v5 = vld [vmem:[%s1282_s2 + $0x58] sm:$0xff] }
  0x4a   :  { %185 = vperm.xlu2 %739, %v44_v16   ;;  %98 = vperm.xlu0 %743, %v44_v16  }
  0x4b   :  { %181 = vperm.xlu1 %738, %v43_v7  }
  0x52   :  { %197 = vperm.xlu2 %739, %v47_v17   ;;  %113 = vperm.xlu0 %743, %v47_v17  }
  0x53   :  { %193 = vperm.xlu1 %738, %v46_v9  }
  0x5a   :  { %209 = vperm.xlu2 %739, %v50_v18   ;;  %128 = vperm.xlu0 %743, %v50_v18  }
  0x5b   :  { %205 = vperm.xlu1 %738, %v49_v11  }
  0x62   :  { %742 = vset.pattern.permute.xlu2 %v790_v3  ;;  %365 = vperm.xlu0 %743, %v343_v19   ;;  %v74_v20 = vpop.permute.xlu2 %73 }
  0x63   :  { %741 = vset.pattern.permute.xlu1 %v790_v3  ;;  %254 = vperm.xlu2 %742, %v835_v1   ;;  %v136_v47 = vmul.f32 %v961_v43, %v74_v20 }
  0x64   :  { %250 = vperm.xlu1 %741, %v36_v13  }
  0x6a   :  { %390 = vperm.xlu0 %743, %v348_v21   ;;  %v903_v22 = vpop.permute.xlu2 %78  ;;  %v356_v21 = vld [vmem:[%s1282_s2 + $0x70] sm:$0xff] }
  0x6b   :  { %262 = vperm.xlu2 %742, %v830_v0  }
  0x6c   :  { %258 = vperm.xlu1 %741, %v38_v6   ;;  %v352_v6 = vld [vmem:[%s1282_s2 + $0x50] sm:$0xff] }
  0x72   :  { %405 = vperm.xlu0 %743, %v351_v23   ;;  %v909_v24 = vpop.permute.xlu2 %93  ;;  %v355_v23 = vld [vmem:[%s1282_s2 + $0x68] sm:$0xff] }
  0x73   :  { %274 = vperm.xlu2 %742, %v856_v8  }
  0x74   :  { %270 = vperm.xlu1 %741, %v41_v15  }
  0x7a   :  { %420 = vperm.xlu0 %743, %v354_v25   ;;  %v915_v26 = vpop.permute.xlu2 %108 }
  0x7b   :  { %v917_v27 = vpop.permute.xlu1 %63  ;;  %286 = vperm.xlu2 %742, %v865_v10   ;;  %v247_v28 = vpop.permute.xlu0 %246 }
  0x7c   :  { %282 = vperm.xlu1 %741, %v44_v16   ;;  %v310_v3 = vmul.f32 %v1000_v59, %v247_v28 }
  0x82   :  { %435 = vperm.xlu0 %743, %v357_v29   ;;  %v923_v30 = vpop.permute.xlu2 %123 }
  0x83   :  { %v925_v31 = vpop.permute.xlu1 %68  ;;  %298 = vperm.xlu2 %742, %v874_v12   ;;  %v928_v32 = vpop.permute.xlu0 %266 }
  0x84   :  { %294 = vperm.xlu1 %741, %v47_v17   ;;  %v135_v17 = vmul.f32 %v961_v43, %v925_v31 }
  0x8a   :  { %498 = vperm.xlu0 %743, %v933_v33  }
  0x8b   :  { %v939_v35 = vpop.permute.xlu1 %88  ;;  %744 = vset.pattern.permute.xlu2 %v791_v4  ;;  %v942_v36 = vpop.permute.xlu0 %278 }
  0x8c   :  { %306 = vperm.xlu1 %741, %v50_v18   ;;  %360 = vperm.xlu2 %744, %v342_v34   ;;  %v154_v37 = vpop.permute.xlu2 %153 }
  0x8d   :  { %v214_v13 = vmul.f32 %v952_v40, %v154_v37  ;;  %v137_v37 = vmul.f32 %v961_v43, %v903_v22 }
  0x92   :  { %513 = vperm.xlu0 %743, %v947_v38  }
  0x93   :  { %v963_v44 = vpop.permute.xlu1 %103  ;;  %v965_v45 = vpop.permute.xlu0 %290 }
  0x94   :  { %745 = vset.pattern.permute.xlu1 %v791_v4  ;;  %375 = vperm.xlu2 %744, %v345_v41   ;;  %v166_v46 = vpop.permute.xlu2 %165 }
  0x95   :  { %v217_v48 = vmul.f32 %v952_v40, %v166_v46  ;;  %370 = vperm.xlu1 %745, %v344_v42   ;;  %v315_v42 = vmul.f32 %v1000_v59, %v928_v32  ;;  %v471_v46 = vld [vmem:[%s1283_s3 + $0x8] sm:$0xff] }
  0x97   :  { %v970_v49 = vadd.f32 %v217_v48, %v136_v47  ;;  %v1051_v47 = vld [vmem:[%s1283_s3] sm:$0xff] }
  0x9a   :  { %528 = vperm.xlu0 %743, %v975_v50  }
  0x9b   :  { %v984_v53 = vpop.permute.xlu1 %118  ;;  %v986_v54 = vpop.permute.xlu0 %302 }
  0x9c   :  { %385 = vperm.xlu2 %744, %v347_v51   ;;  %v174_v55 = vpop.permute.xlu2 %173 }
  0x9d   :  { %380 = vperm.xlu1 %745, %v346_v52   ;;  %v219_v29 = vmul.f32 %v952_v40, %v174_v55 }
  0xa2   :  { %543 = vperm.xlu0 %743, %v991_v56  }
  0xa4   :  { %400 = vperm.xlu2 %744, %v350_v57   ;;  %v186_v60 = vpop.permute.xlu2 %185  ;;  %v54_v61 = vpop.permute.xlu0 %53  ;;  %v140_v57 = vmul.f32 %v961_v43, %v909_v24 }
  0xa5   :  { %v132_v62 = vmul.f32 %v961_v43, %v54_v61  ;;  %395 = vperm.xlu1 %745, %v349_v58   ;;  %v150_v63 = vpop.permute.xlu1 %149  ;;  %v222_v51 = vmul.f32 %v952_v40, %v186_v60  ;;  %v1071_v60 = vld [vmem:[%s1283_s3 + $0x20] sm:$0xff] }
  0xa6   :  { %v213_v0 = vmul.f32 %v952_v40, %v150_v63  ;;  %v1076_v63 = vld [vmem:[%s1283_s3 + $0x18] sm:$0xff] }
  0xa8   :  { %v229_v4 = vadd.f32 %v213_v0, %v132_v62 }
  0xaa   :  { %558 = vperm.xlu0 %743, %v1007_v2   ;;  %v1017_v7 = vadd.f32 %v310_v3, %v229_v4 }
  0xac   :  { %415 = vperm.xlu2 %744, %v353_v5   ;;  %v198_v9 = vpop.permute.xlu2 %197  ;;  %v59_v11 = vpop.permute.xlu0 %58 }
  0xad   :  { %v133_v15 = vmul.f32 %v961_v43, %v59_v11  ;;  %410 = vperm.xlu1 %745, %v352_v6   ;;  %v162_v16 = vpop.permute.xlu1 %161  ;;  %v143_v6 = vmul.f32 %v961_v43, %v915_v26  ;;  %v476_v26 = vld [vmem:[%s1283_s3 + $0x30] sm:$0xff] }
  0xae   :  { %v216_v18 = vmul.f32 %v952_v40, %v162_v16 }
  0xaf   :  { %v1024_v19 = vadd.f32 %v214_v13, %v133_v15 }
  0xb0   :  { %v1026_v20 = vadd.f32 %v216_v18, %v135_v17  ;;  %v1099_v17 = vld [vmem:[%s1283_s3 + $0x38] sm:$0xff] }
  0xb2   :  { %746 = vset.pattern.permute.xlu0 %v792_v14 }
  0xb3   :  { %157 = vperm.xlu0 %746, %v835_v1  }
  0xb4   :  { %430 = vperm.xlu2 %744, %v356_v21   ;;  %v210_v25 = vpop.permute.xlu2 %209  ;;  %v84_v28 = vpop.permute.xlu0 %83 }
  0xb5   :  { %v138_v31 = vmul.f32 %v961_v43, %v84_v28  ;;  %425 = vperm.xlu1 %745, %v355_v23   ;;  %v170_v34 = vpop.permute.xlu1 %169  ;;  %v228_v21 = vmul.f32 %v952_v40, %v210_v25  ;;  %v1122_v25 = vld [vmem:[%s1283_s3 + $0x50] sm:$0xff] }
  0xb6   :  { %v218_v39 = vmul.f32 %v952_v40, %v170_v34 }
  0xb7   :  { %v1041_v41 = vadd.f32 %v219_v29, %v138_v31  ;;  %v146_v29 = vmul.f32 %v961_v43, %v923_v30 }
  0xb8   :  { %v234_v1 = vadd.f32 %v218_v39, %v137_v37  ;;  %v479_v39 = vld [vmem:[%s1283_s3 + $0x48] sm:$0xff] }
  0xba   :  { %v1053_v48 = vadd.f32 %v315_v42, %v234_v1 }
  0xbb   :  { %177 = vperm.xlu0 %746, %v856_v8   ;;  %v318_v8 = vmul.f32 %v1000_v59, %v942_v36  ;;  %v225_v36 = vmul.f32 %v952_v40, %v198_v9 }
  0xbc   :  { %493 = vperm.xlu2 %744, %v471_v46   ;;  %v99_v22 = vpop.permute.xlu0 %98 }
  0xbd   :  { %v141_v32 = vmul.f32 %v961_v43, %v99_v22  ;;  %488 = vperm.xlu1 %745, %v1051_v47   ;;  %v182_v52 = vpop.permute.xlu1 %181  ;;  %v1059_v55 = vpop.permute.xlu2 %254 }
  0xbe   :  { %v221_v58 = vmul.f32 %v952_v40, %v182_v52 }
  0xbf   :  { %v1064_v61 = vadd.f32 %v222_v51, %v141_v32  ;;  %v1137_v32 = vld [vmem:[%s1283_s3 + $0x68] sm:$0xff] }
  0xc0   :  { %v237_v62 = vadd.f32 %v221_v58, %v140_v57 }
  0xc2   :  { %v1078_v0 = vadd.f32 %v318_v8, %v237_v62 }
  0xc3   :  { %189 = vperm.xlu0 %746, %v865_v10   ;;  %v321_v10 = vmul.f32 %v1000_v59, %v965_v45 }
  0xc4   :  { %508 = vperm.xlu2 %744, %v1071_v60   ;;  %v114_v24 = vpop.permute.xlu0 %113 }
  0xc5   :  { %v144_v3 = vmul.f32 %v961_v43, %v114_v24  ;;  %503 = vperm.xlu1 %745, %v1076_v63   ;;  %v194_v4 = vpop.permute.xlu1 %193  ;;  %v263_v5 = vpop.permute.xlu2 %262  ;;  %v485_v24 = vld [vmem:[%s1283_s3 + $0x78] sm:$0xff] }
  0xc6   :  { %v224_v11 = vmul.f32 %v952_v40, %v194_v4  ;;  %v314_v13 = vmul.f32 %v1000_v59, %v263_v5 }
  0xc7   :  { %v1089_v15 = vadd.f32 %v225_v36, %v144_v3 }
  0xc8   :  { %v240_v16 = vadd.f32 %v224_v11, %v143_v6  ;;  %v1094_v9 = vadd.f32 %v314_v13, %v970_v49 }
  0xca   :  { %v1104_v18 = vadd.f32 %v321_v10, %v240_v16 }
  0xcb   :  { %201 = vperm.xlu0 %746, %v874_v12   ;;  %v324_v12 = vmul.f32 %v1000_v59, %v986_v54 }
  0xcc   :  { %523 = vperm.xlu2 %744, %v1099_v17   ;;  %v129_v45 = vpop.permute.xlu0 %128 }
  0xcd   :  { %v147_v49 = vmul.f32 %v961_v43, %v129_v45  ;;  %518 = vperm.xlu1 %745, %v476_v26   ;;  %v206_v23 = vpop.permute.xlu1 %205  ;;  %v1110_v28 = vpop.permute.xlu2 %274 }
  0xce   :  { %v227_v31 = vmul.f32 %v952_v40, %v206_v23 }
  0xcf   :  { %v1115_v34 = vadd.f32 %v228_v21, %v147_v49 }
  0xd0   :  { %v243_v37 = vadd.f32 %v227_v31, %v146_v29 }
  0xd2   :  { %v1127_v42 = vadd.f32 %v324_v12, %v243_v37 }
  0xd3   :  { %611 = vperm.xlu0 %746, %v471_v46   ;;  %v482_v46 = vld [vmem:[%s1283_s3 + $0x60] sm:$0xff]  ;;  %s603_s3 = sld [smem:[#allocation2]] }
  0xd4   :  { %538 = vperm.xlu2 %744, %v1122_v25   ;;  %v366_v30 = vpop.permute.xlu0 %365 }
  0xd5   :  { %533 = vperm.xlu1 %745, %v479_v39   ;;  %v1130_v1 = vpop.permute.xlu2 %286 }
  0xd6   :  { %v251_v54 = vpop.permute.xlu1 %250 }
  0xd7   :  { %v311_v22 = vmul.f32 %v1000_v59, %v251_v54 }
  0xd9   :  { %v327_v51 = vadd.f32 %v311_v22, %v1024_v19 }
  0xdb   :  { %631 = vperm.xlu0 %746, %v476_v26   ;;  %v1142_v52 = vadd.f32 %v366_v30, %v327_v51 }
  0xdc   :  { %553 = vperm.xlu2 %744, %v1137_v32   ;;  %v391_v57 = vpop.permute.xlu0 %390 }
  0xdd   :  { %548 = vperm.xlu1 %745, %v482_v46   ;;  %v1145_v58 = vpop.permute.xlu2 %298 }
  0xde   :  { %v259_v8 = vpop.permute.xlu1 %258 }
  0xdf   :  { %v313_v19 = vmul.f32 %v1000_v59, %v259_v8 }
  0xe1   :  { %v329_v62 = vadd.f32 %v313_v19, %v1026_v20 }
  0xe3   :  { %643 = vperm.xlu0 %746, %v479_v39  }
  0xe4   :  { %747 = vset.pattern.permute.xlu2 %v792_v14  ;;  %v406_v36 = vpop.permute.xlu0 %405 }
  0xe5   :  { %563 = vperm.xlu1 %745, %v485_v24   ;;  %607 = vperm.xlu2 %747, %v1051_v47  }
  0xe6   :  { %v271_v3 = vpop.permute.xlu1 %270  ;;  %v361_v4 = vpop.permute.xlu2 %360 }
  0xe7   :  { %v316_v5 = vmul.f32 %v1000_v59, %v271_v3  ;;  %v1156_v6 = vadd.f32 %v361_v4, %v1017_v7 }
  0xe9   :  { %v332_v20 = vadd.f32 %v316_v5, %v1041_v41 }
  0xeb   :  { %655 = vperm.xlu0 %746, %v482_v46   ;;  %v1159_v11 = vadd.f32 %v391_v57, %v332_v20  ;;  %v312_v20 = vmul.f32 %v1000_v59, %v1059_v55 }
  0xec   :  { %v421_v13 = vpop.permute.xlu0 %420 }
  0xed   :  { %748 = vset.pattern.permute.xlu1 %v792_v14  ;;  %619 = vperm.xlu2 %747, %v1076_v63  }
  0xee   :  { %615 = vperm.xlu1 %748, %v933_v33   ;;  %v283_v47 = vpop.permute.xlu1 %282  ;;  %v376_v10 = vpop.permute.xlu2 %375 }
  0xef   :  { %v319_v16 = vmul.f32 %v1000_v59, %v283_v47  ;;  %v1165_v26 = vadd.f32 %v376_v10, %v329_v62 }
  0xf1   :  { %v335_v7 = vadd.f32 %v319_v16, %v1064_v61  ;;  %v139_v16 = vmul.f32 %v961_v43, %v939_v35 }
  0xf3   :  { %667 = vperm.xlu0 %746, %v485_v24   ;;  %v1168_v41 = vadd.f32 %v406_v36, %v335_v7  ;;  %v134_v36 = vmul.f32 %v961_v43, %v917_v27 }
  0xf4   :  { %v436_v45 = vpop.permute.xlu0 %435 }
  0xf5   :  { %627 = vperm.xlu2 %747, %v947_v38  }
  0xf6   :  { %623 = vperm.xlu1 %748, %v1071_v60   ;;  %v295_v14 = vpop.permute.xlu1 %294  ;;  %v386_v63 = vpop.permute.xlu2 %385 }
  0xf7   :  { %v322_v33 = vmul.f32 %v1000_v59, %v295_v14  ;;  %v1174_v21 = vadd.f32 %v386_v63, %v1053_v48  ;;  %v455_v14 = vmax.f32 %v1142_v52, 0.0 }
  0xf9   :  { %v338_v49 = vadd.f32 %v322_v33, %v1089_v15  ;;  %v459_v48 = vmax.f32 %v1174_v21, 0.0  ;;  %v317_v33 = vmul.f32 %v1000_v59, %v1110_v28 }
  0xfb   :  { %v1177_v23 = vadd.f32 %v421_v13, %v338_v49 }
  0xfc   :  { %v499_v61 = vpop.permute.xlu0 %498 }
  0xfd   :  { %639 = vperm.xlu2 %747, %v975_v50  }
  0xfe   :  { %635 = vperm.xlu1 %748, %v1099_v17   ;;  %v307_v29 = vpop.permute.xlu1 %306  ;;  %v401_v38 = vpop.permute.xlu2 %400 }
  0xff   :  { %v325_v60 = vmul.f32 %v1000_v59, %v307_v29  ;;  %v1183_v31 = vadd.f32 %v401_v38, %v1078_v0 }
 0x101   :  { %v341_v12 = vadd.f32 %v325_v60, %v1115_v34  ;;  %v462_v34 = vmax.f32 %v1183_v31, 0.0 }
 0x103   :  { %v1187_v37 = vadd.f32 %v436_v45, %v341_v12  ;;  %v454_v45 = vmax.f32 %v1156_v6, 0.0 }
 0x104   :  { %v514_v15 = vpop.permute.xlu0 %513 }
 0x105   :  { %v1191_v39 = vmul.f32 %v514_v15, %v459_v48  ;;  %651 = vperm.xlu2 %747, %v991_v56  }
 0x106   :  { %647 = vperm.xlu1 %748, %v1122_v25   ;;  %v416_v50 = vpop.permute.xlu2 %415 }
 0x107   :  { %v1196_v17 = vadd.f32 %v416_v50, %v1104_v18  ;;  %v371_v0 = vpop.permute.xlu1 %370 }
 0x109   :  { %v465_v51 = vmax.f32 %v1196_v17, 0.0 }
 0x10c   :  { %v529_v30 = vpop.permute.xlu0 %528 }
 0x10d   :  { %v1201_v54 = vmul.f32 %v529_v30, %v462_v34  ;;  %663 = vperm.xlu2 %747, %v1007_v2   ;;  %v457_v30 = vmax.f32 %v1165_v26, 0.0 }
 0x10e   :  { %659 = vperm.xlu1 %748, %v1137_v32   ;;  %v431_v22 = vpop.permute.xlu2 %430 }
 0x10f   :  { %v1206_v56 = vadd.f32 %v431_v22, %v1127_v42  ;;  %v381_v25 = vpop.permute.xlu1 %380 }
 0x110   :  { %v1209_v18 = vadd.f32 %v381_v25, %v1094_v9  ;;  %v320_v25 = vmul.f32 %v1000_v59, %v1130_v1  ;;  %v460_v1 = vmax.f32 %v1159_v11, 0.0 }
 0x111   :  { %v468_v2 = vmax.f32 %v1206_v56, 0.0 }
 0x114   :  { %v544_v46 = vpop.permute.xlu0 %543 }
 0x115   :  { %v1214_v57 = vmul.f32 %v544_v46, %v465_v51  ;;  %v458_v46 = vmax.f32 %v1209_v18, 0.0 }
 0x116   :  { %v494_v8 = vpop.permute.xlu2 %493 }
 0x117   :  { %v396_v19 = vpop.permute.xlu1 %395  ;;  %v567_v29 = vmul.f32 %v494_v8, %v455_v14 }
 0x11c   :  { %v559_v32 = vpop.permute.xlu0 %558 }
 0x11d   :  { %v1219_v42 = vmul.f32 %v559_v32, %v468_v2 }
 0x11e   :  { %v509_v62 = vpop.permute.xlu2 %508 }
 0x11f   :  { %v411_v24 = vpop.permute.xlu1 %410 }
 0x125   :  { %v158_v9 = vpop.permute.xlu0 %157 }
 0x126   :  { %v215_v3 = vmul.f32 %v952_v40, %v158_v9  ;;  %v524_v4 = vpop.permute.xlu2 %523 }
 0x127   :  { %v426_v5 = vpop.permute.xlu1 %425 }
 0x128   :  { %v231_v13 = vadd.f32 %v215_v3, %v134_v36 }
 0x12a   :  { %v328_v47 = vadd.f32 %v312_v20, %v231_v13 }
 0x12c   :  { %v1226_v10 = vadd.f32 %v371_v0, %v328_v47  ;;  %v142_v0 = vmul.f32 %v961_v43, %v963_v44  ;;  %v145_v44 = vmul.f32 %v961_v43, %v984_v53 }
 0x12d   :  { %v178_v7 = vpop.permute.xlu0 %177 }
 0x12e   :  { %v456_v27 = vmax.f32 %v1226_v10, 0.0  ;;  %v220_v63 = vmul.f32 %v952_v40, %v178_v7  ;;  %v539_v55 = vpop.permute.xlu2 %538 }
 0x12f   :  { %v489_v49 = vpop.permute.xlu1 %488 }
 0x130   :  { %v236_v38 = vadd.f32 %v220_v63, %v139_v16  ;;  %v566_v60 = vmul.f32 %v489_v49, %v454_v45  ;;  %v568_v35 = vmul.f32 %v499_v61, %v456_v27 }
 0x132   :  { %v333_v12 = vadd.f32 %v317_v33, %v236_v38  ;;  %v582_v15 = vadd.f32 %v567_v29, %v566_v60 }
 0x134   :  { %v1238_v6 = vadd.f32 %v396_v19, %v333_v12  ;;  %v583_v52 = vadd.f32 %v582_v15, %v568_v35  ;;  %v570_v19 = vmul.f32 %v509_v62, %v458_v46  ;;  %v323_v62 = vmul.f32 %v1000_v59, %v1145_v58 }
 0x135   :  { %v190_v50 = vpop.permute.xlu0 %189 }
 0x136   :  { %v223_v28 = vmul.f32 %v952_v40, %v190_v50  ;;  %v554_v32 = vpop.permute.xlu2 %553  ;;  %v461_v13 = vmax.f32 %v1238_v6, 0.0 }
 0x137   :  { %v504_v22 = vpop.permute.xlu1 %503 }
 0x138   :  { %v239_v61 = vadd.f32 %v223_v28, %v142_v0  ;;  %v569_v8 = vmul.f32 %v504_v22, %v457_v30  ;;  %v573_v33 = vmul.f32 %v524_v4, %v461_v13 }
 0x13a   :  { %v336_v9 = vadd.f32 %v320_v25, %v239_v61  ;;  %v584_v36 = vadd.f32 %v583_v52, %v569_v8 }
 0x13c   :  { %v1247_v3 = vadd.f32 %v411_v24, %v336_v9  ;;  %v585_v20 = vadd.f32 %v584_v36, %v570_v19 }
 0x13d   :  { %v202_v26 = vpop.permute.xlu0 %201 }
 0x13e   :  { %v226_v47 = vmul.f32 %v952_v40, %v202_v26  ;;  %v586_v18 = vadd.f32 %v585_v20, %v1191_v39  ;;  %v463_v40 = vmax.f32 %v1168_v41, 0.0  ;;  %v464_v11 = vmax.f32 %v1247_v3, 0.0 }
 0x13f   :  { %v519_v16 = vpop.permute.xlu1 %518  ;;  %v608_v29 = vpop.permute.xlu2 %607 }
 0x140   :  { %v242_v7 = vadd.f32 %v226_v47, %v145_v44  ;;  %v572_v24 = vmul.f32 %v519_v16, %v460_v1  ;;  %v670_v60 = vmul.f32 %v608_v29, %v454_v45  ;;  %v576_v15 = vmul.f32 %v539_v55, %v464_v11 }
 0x142   :  { %v339_v63 = vadd.f32 %v323_v62, %v242_v7  ;;  %v587_v49 = vadd.f32 %v586_v18, %v572_v24 }
 0x144   :  { %v1257_v43 = vadd.f32 %v426_v5, %v339_v63  ;;  %v588_v53 = vadd.f32 %v587_v49, %v573_v33  ;;  %v466_v5 = vmax.f32 %v1177_v23, 0.0 }
 0x145   :  { %v612_v38 = vpop.permute.xlu0 %611 }
 0x146   :  { %v671_v39 = vmul.f32 %v612_v38, %v455_v14  ;;  %v589_v35 = vadd.f32 %v588_v53, %v1201_v54  ;;  %v467_v52 = vmax.f32 %v1257_v43, 0.0  ;;  %v469_v14 = vmax.f32 %v1187_v37, 0.0 }
 0x147   :  { %v534_v12 = vpop.permute.xlu1 %533  ;;  %v620_v61 = vpop.permute.xlu2 %619 }
 0x148   :  { %v686_v59 = vadd.f32 %v671_v39, %v670_v60  ;;  %v575_v58 = vmul.f32 %v534_v12, %v463_v40  ;;  %v579_v28 = vmul.f32 %v554_v32, %v467_v52  ;;  %v673_v36 = vmul.f32 %v620_v61, %v457_v30 }
 0x14a   :  { %v590_v6 = vadd.f32 %v589_v35, %v575_v58 }
 0x14c   :  { %v591_v4 = vadd.f32 %v590_v6, %v576_v15 }
 0x14d   :  { %v632_v3 = vpop.permute.xlu0 %631 }
 0x14e   :  { %v592_v50 = vadd.f32 %v591_v4, %v1214_v57  ;;  %v676_v47 = vmul.f32 %v632_v3, %v460_v1 }
 0x14f   :  { %v549_v0 = vpop.permute.xlu1 %548  ;;  %v628_v23 = vpop.permute.xlu2 %627 }
 0x150   :  { %v578_v41 = vmul.f32 %v549_v0, %v466_v5  ;;  %v675_v37 = vmul.f32 %v628_v23, %v459_v48 }
 0x152   :  { %v593_v22 = vadd.f32 %v592_v50, %v578_v41 }
 0x154   :  { %v594_v45 = vadd.f32 %v593_v22, %v579_v28  ;;  %v708_v28 = vstv %s730_s10 }
 0x155   :  { %v644_v16 = vpop.permute.xlu0 %643 }
 0x156   :  { %v595_v54 = vadd.f32 %v594_v45, %v1219_v42  ;;  %v679_v30 = vmul.f32 %v644_v16, %v463_v40 }
 0x157   :  { %v564_v25 = vpop.permute.xlu1 %563  ;;  %v640_v42 = vpop.permute.xlu2 %639 }
 0x158   :  { %v581_v55 = vmul.f32 %v564_v25, %v469_v14  ;;  %v678_v10 = vmul.f32 %v640_v42, %v462_v34 }
 0x15a   :  { %v596_v8 = vadd.f32 %v595_v54, %v581_v55 }
 0x15c   :  { %v597_v43 = vrot.slane %v596_v8, 4 }
 0x15e   :  { %v598_v31 = vadd.f32 %v597_v43, %v596_v8 }
 0x15f   :  { %v652_v33 = vpop.permute.xlu2 %651 }
 0x160   :  { %v616_v19 = vpop.permute.xlu1 %615  ;;  %v681_v48 = vmul.f32 %v652_v33, %v465_v51 }
 0x161   :  { %v672_v9 = vmul.f32 %v616_v19, %v456_v27 }
 0x163   :  { %v687_v57 = vadd.f32 %v686_v59, %v672_v9  ;;  %v599_v59 = vrot.slane %v598_v31, 2 }
 0x165   :  { %v688_v20 = vadd.f32 %v687_v57, %v673_v36  ;;  %v600_v17 = vadd.f32 %v599_v59, %v598_v31 }
 0x167   :  { %v601_v4 = vrot.slane %v600_v17, 1 }
 0x168   :  { %v624_v32 = vpop.permute.xlu1 %623 }
 0x169   :  { %v674_v44 = vmul.f32 %v624_v32, %v458_v46  ;;  %v656_v46 = vpop.permute.xlu0 %655  ;;  %v602_v0 = vadd.f32 %v601_v4, %v600_v17 }
 0x16a   :  { %v682_v53 = vmul.f32 %v656_v46, %v466_v5 }
 0x16b   :  { %v689_v26 = vadd.f32 %v688_v20, %v674_v44 }
 0x16d   :  { %v690_v18 = vadd.f32 %v689_v26, %v675_v37 }
 0x16f   :  { %v691_v62 = vadd.f32 %v690_v18, %v676_v47 }
 0x170   :  { %v636_v7 = vpop.permute.xlu1 %635 }
 0x171   :  { %v677_v24 = vmul.f32 %v636_v7, %v461_v13  ;;  %v664_v13 = vpop.permute.xlu2 %663  ;;  %v668_v35 = vpop.permute.xlu0 %667 }
 0x172   :  { %v684_v40 = vmul.f32 %v664_v13, %v468_v2  ;;  %v685_v58 = vmul.f32 %v668_v35, %v469_v14 }
 0x173   :  { %v692_v27 = vadd.f32 %v691_v62, %v677_v24 }
 0x175   :  { %v693_v63 = vadd.f32 %v692_v27, %v678_v10 }
 0x177   :  { %v694_v49 = vadd.f32 %v693_v63, %v679_v30 }
 0x178   :  { %v648_v29 = vpop.permute.xlu1 %647 }
 0x179   :  { %v680_v21 = vmul.f32 %v648_v29, %v464_v11 }
 0x17b   :  { %v695_v1 = vadd.f32 %v694_v49, %v680_v21 }
 0x17d   :  { %v696_v38 = vadd.f32 %v695_v1, %v681_v48 }
 0x17f   :  { %v697_v60 = vadd.f32 %v696_v38, %v682_v53 }
 0x180   :  { %v660_v39 = vpop.permute.xlu1 %659 }
 0x181   :  { %v683_v34 = vmul.f32 %v660_v39, %v467_v52  ;;  %v604_v52 = vstv %s603_s3 }
 0x182   :  { %v605_v56 = vadd.f32 %v604_v52, %v602_v0 }
 0x183   :  { %v698_v12 = vadd.f32 %v697_v60, %v683_v34 }
 0x185   :  { %v699_v11 = vadd.f32 %v698_v12, %v684_v40 }
 0x187   :  { %v700_v15 = vadd.f32 %v699_v11, %v685_v58 }
 0x189   :  { %v701_v51 = vrot.slane %v700_v15, 4 }
 0x18b   :  { %v702_v6 = vadd.f32 %v701_v51, %v700_v15 }
 0x18d   :  { %v703_v5 = vrot.slane %v702_v6, 2 }
 0x18f   :  { %v704_v50 = vadd.f32 %v703_v5, %v702_v6 }
 0x191   :  { %v705_v41 = vrot.slane %v704_v50, 1 }
 0x193   :  { %v706_v22 = vadd.f32 %v705_v41, %v704_v50 }
 0x195   :  { %v709_v2 = vadd.f32 %v708_v28, %v706_v22 }
 0x197   :  { %v711_v45 = vsel %vm710_vm0, %v605_v56, %v709_v2 }
 0x198   :  { %712 = vst [vmem:[#allocation5] sm:$0x3] %v711_v45 }
 0x199   :  { %723 = dma.vmem_to_hbm [thread:$0]  %s719_s12, 32, %s721_s15, [#allocation3]  }
 0x19a   :  { %787 = dma.done.wait [#allocation3], 32  }
 0x19b   :  { %788 = vsyncadd [#allocation3], 4294967264 }
 0x19c   :  { %728 = vsyncpa [#allocation3], 1 }
 0x19d   :  { %729 = vsyncpa [#allocation4], 1 }

</bundles_post_ra>
